<compile_context>
chip_gen: v6e
topology: v6e:2x2x1
jax: 0.10.0
libtpu: 0.0.40
codegen_flags: <defaults>
</compile_context>

<pallas_src>
import functools

import jax
import jax.numpy as jnp
from jax import lax
from jax.experimental import pallas as pl
from jax.experimental.pallas import tpu as pltpu


def _cell_kernel(p_ref, w_ref, b_ref, out_ref, *, Cout):
    """One row-tile per grid step.

    p_ref  : (TR, 9*Cin)      im2col patch rows (tap-major, channel-minor)
    w_ref  : (9*Cin, 2*Cout)  fused weights: [:, :Cout]=gated 3x3, [:, Cout:]=1x1 @ center tap
    b_ref  : (1, 2*Cout)      fused biases:  [b3*gate, b1]
    out_ref: (TR, Cout)
    """
    y = jnp.dot(p_ref[...], w_ref[...], preferred_element_type=jnp.float32)
    y = jnp.maximum(y + b_ref[...], 0.0)          # ReLU on the full 128-wide MXU result
    out_ref[...] = y[:, :Cout] + y[:, Cout:]      # main branch + residual branch


def cell_forward(x_nchw, w3_hwio, b3, channel_scale, w1_io, b1, sigmoid_scale=5.0):
    """Cell.forward for the default config. Input/output are NCHW float32."""
    N, Cin, H, W = x_nchw.shape
    Cout = w3_hwio.shape[-1]
    K = 9 * Cin
    rows = N * H * W

    # --- activation prep: NCHW -> NHWC, pad=1, im2col (tap-major, channel-minor) ---
    x_nhwc = jnp.transpose(x_nchw, (0, 2, 3, 1)).astype(jnp.float32)
    x_pad = jnp.pad(x_nhwc, ((0, 0), (1, 1), (1, 1), (0, 0)))
    patches = jnp.concatenate(
        [x_pad[:, dy:dy + H, dx:dx + W, :] for dy in range(3) for dx in range(3)],
        axis=-1).reshape(rows, K)

    # --- weight prep: fold sigmoid gate into 3x3 weights/bias, fuse with 1x1 branch ---
    gate = jax.nn.sigmoid(sigmoid_scale * channel_scale.astype(jnp.float32))     # (Cout,)
    w3_g = w3_hwio.reshape(K, Cout).astype(jnp.float32) * gate[None, :]           # gated 3x3
    w1_ctr = jnp.pad(w1_io.astype(jnp.float32), ((4 * Cin, 4 * Cin), (0, 0)))     # 1x1 @ center tap
    w_comb = jnp.concatenate([w3_g, w1_ctr], axis=1)                              # (K, 2*Cout)
    b_comb = jnp.concatenate([b3.astype(jnp.float32) * gate,
                              b1.astype(jnp.float32)]).reshape(1, 2 * Cout)

    # --- row tiling: parallel grid axis (feeds both TCs on v7x; negligible cost on v5e/v6e) ---
    TR = min(256, ((rows + 7) // 8) * 8)
    rows_p = pl.cdiv(rows, TR) * TR
    if rows_p != rows:
        patches = jnp.pad(patches, ((0, rows_p - rows), (0, 0)))

    kern = functools.partial(_cell_kernel, Cout=Cout)
    out_flat = pl.pallas_call(
        kern,
        out_shape=jax.ShapeDtypeStruct((rows_p, Cout), jnp.float32),
        grid=(rows_p // TR,),
        in_specs=[
            pl.BlockSpec((TR, K), lambda r: (r, 0)),
            pl.BlockSpec((K, 2 * Cout), lambda r: (0, 0)),   # grid-invariant: stays in VMEM
            pl.BlockSpec((1, 2 * Cout), lambda r: (0, 0)),   # grid-invariant: stays in VMEM
        ],
        out_specs=pl.BlockSpec((TR, Cout), lambda r: (r, 0)),
        compiler_params=pltpu.CompilerParams(dimension_semantics=("parallel",)),
    )(patches, w_comb, b_comb)

    out_nhwc = out_flat[:rows].reshape(N, H, W, Cout)
    return jnp.transpose(out_nhwc, (0, 3, 1, 2))  # back to NCHW


def cell_reference(x_nchw, w3_hwio, b3, channel_scale, w1_io, b1, sigmoid_scale=5.0):
    """Pure-JAX reference (lax.conv), mirrors the PyTorch forward."""
    x_nhwc = jnp.transpose(x_nchw, (0, 2, 3, 1)).astype(jnp.float32)
    conv3 = lax.conv_general_dilated(
        x_nhwc, w3_hwio, (1, 1), ((1, 1), (1, 1)),
        dimension_numbers=('NHWC', 'HWIO', 'NHWC'))
    gate = jax.nn.sigmoid(sigmoid_scale * channel_scale)[None, None, None, :]
    main = jnp.maximum((conv3 + b3[None, None, None, :]) * gate, 0.0)
    conv1 = lax.conv_general_dilated(
        x_nhwc, w1_io[None, None], (1, 1), ((0, 0), (0, 0)),
        dimension_numbers=('NHWC', 'HWIO', 'NHWC'))
    res = jnp.maximum(conv1 + b1[None, None, None, :], 0.0)
    return jnp.transpose(main + res, (0, 3, 1, 2))


if __name__ == "__main__":
    # Small shapes consistent with the module: Cell(in1_channels=4), default
    # convolutions -> out_channels=64, 3x3 conv + 1x1 residual conv, no BN,
    # dropout disabled (default), ReLU enabled.
    N, Cin, H, W = 2, 4, 16, 16
    Cout = 64
    sigmoid_scale = 5.0

    key = jax.random.PRNGKey(0)
    k_w3, k_b3, k_w1, k_b1, k_x = jax.random.split(key, 5)

    # Deterministic parameter init (kaiming fan_out style for conv weights,
    # small uniform for biases, channel_scale initialized to ones as in ConvBR).
    w3 = jax.random.normal(k_w3, (3, 3, Cin, Cout), jnp.float32) * jnp.sqrt(2.0 / (Cout * 9))
    b3 = jax.random.uniform(k_b3, (Cout,), jnp.float32, -1.0, 1.0) / jnp.sqrt(Cin * 9.0)
    channel_scale = jnp.ones((Cout,), jnp.float32)
    w1 = jax.random.normal(k_w1, (Cin, Cout), jnp.float32) * jnp.sqrt(2.0 / Cout)
    b1 = jax.random.uniform(k_b1, (Cout,), jnp.float32, -1.0, 1.0) / jnp.sqrt(float(Cin))

    x = jax.random.normal(k_x, (N, Cin, H, W), jnp.float32)

    y = cell_forward(x, w3, b3, channel_scale, w1, b1, sigmoid_scale)
    y = jax.block_until_ready(y)

    y_ref = cell_reference(x, w3, b3, channel_scale, w1, b1, sigmoid_scale)
    assert y.shape == (N, Cout, H, W), y.shape
    assert jnp.allclose(y, y_ref, rtol=1e-4, atol=1e-4), "mismatch vs JAX reference"

    print("KERNEL_OK")
</pallas_src>

<mosaic_0001>
module attributes {stable_mosaic.version = 11 : i64} {
  func.func @_cell_kernel(%arg0: i32, %arg1: memref<256x36xf32, #tpu.memory_space<vmem>>, %arg2: memref<36x128xf32, #tpu.memory_space<vmem>>, %arg3: memref<1x128xf32, #tpu.memory_space<vmem>>, %arg4: memref<256x64xf32, #tpu.memory_space<vmem>>) attributes {dimension_semantics = [#tpu.dimension_semantics<parallel>], iteration_bounds = array<i64: 2>, scalar_prefetch = 0 : i64, scratch_operands = 0 : i64, tpu.core_type = #tpu.core_type<tc>, window_params = [{transform_indices = @transform_0, window_bounds = array<i64: 256, 36>}, {pipeline_mode = #tpu.pipeline_mode<synchronous>, transform_indices = @transform_1, window_bounds = array<i64: 36, 128>}, {pipeline_mode = #tpu.pipeline_mode<synchronous>, transform_indices = @transform_2, window_bounds = array<i64: 1, 128>}, {transform_indices = @transform_3, window_bounds = array<i64: 256, 64>}]} {
    %c0 = arith.constant 0 : index
    %c0_0 = arith.constant 0 : index
    %0 = vector.load %arg1[%c0, %c0_0] : memref<256x36xf32, #tpu.memory_space<vmem>>, vector<256x36xf32>
    %c0_1 = arith.constant 0 : index
    %c0_2 = arith.constant 0 : index
    %1 = vector.load %arg2[%c0_1, %c0_2] : memref<36x128xf32, #tpu.memory_space<vmem>>, vector<36x128xf32>
    %cst = arith.constant dense<0.000000e+00> : vector<256x128xf32>
    %2 = tpu.matmul %0, %1, %cst {dimension_numbers = #tpu.dot_dimension_numbers<[1], [0], [0], [1], [0, 0, 1, 1], [], []>} : vector<256x36xf32>, vector<36x128xf32>, vector<256x128xf32> -> vector<256x128xf32>
    %c0_3 = arith.constant 0 : index
    %c0_4 = arith.constant 0 : index
    %3 = vector.load %arg3[%c0_3, %c0_4] : memref<1x128xf32, #tpu.memory_space<vmem>>, vector<1x128xf32>
    %4 = vector.broadcast %3 : vector<1x128xf32> to vector<256x128xf32>
    %5 = arith.addf %2, %4 : vector<256x128xf32>
    %cst_5 = arith.constant 0.000000e+00 : f32
    %6 = vector.broadcast %cst_5 : f32 to vector<256x128xf32>
    %7 = arith.maximumf %5, %6 : vector<256x128xf32>
    %8 = vector.extract_strided_slice %7 {offsets = [0, 0], sizes = [256, 64], strides = [1, 1]} : vector<256x128xf32> to vector<256x64xf32>
    %9 = vector.extract_strided_slice %7 {offsets = [0, 64], sizes = [256, 64], strides = [1, 1]} : vector<256x128xf32> to vector<256x64xf32>
    %10 = arith.addf %8, %9 : vector<256x64xf32>
    %c0_6 = arith.constant 0 : index
    %c0_7 = arith.constant 0 : index
    %11 = vector.load %arg4[%c0_6, %c0_7] : memref<256x64xf32, #tpu.memory_space<vmem>>, vector<256x64xf32>
    tpu.vector_store %arg4[%c0_6, %c0_7], %10 {strides = array<i32>} : memref<256x64xf32, #tpu.memory_space<vmem>>, vector<256x64xf32>,
    return
  }
  func.func @transform_0(%arg0: i32) -> (i32, i32) {
    %c0_i32 = arith.constant 0 : i32
    %c0_i32_0 = arith.constant 0 : i32
    return %arg0, %c0_i32 : i32, i32
  }
  func.func @transform_1(%arg0: i32) -> (i32, i32) {
    %c0_i32 = arith.constant 0 : i32
    %c0_i32_0 = arith.constant 0 : i32
    %c0_i32_1 = arith.constant 0 : i32
    return %c0_i32, %c0_i32_0 : i32, i32
  }
  func.func @transform_2(%arg0: i32) -> (i32, i32) {
    %c0_i32 = arith.constant 0 : i32
    %c0_i32_0 = arith.constant 0 : i32
    %c0_i32_1 = arith.constant 0 : i32
    return %c0_i32, %c0_i32_0 : i32, i32
  }
  func.func @transform_3(%arg0: i32) -> (i32, i32) {
    %c0_i32 = arith.constant 0 : i32
    %c0_i32_0 = arith.constant 0 : i32
    return %arg0, %c0_i32 : i32, i32
  }
}

</mosaic_0001>

<bundles_post_ra>
// kernel: tpu_custom_call.1
= control target key start
LH: loop header
LB: loop body
LE: loop exit
PB: predicated region body
PF: predicated region fallthrough
CT: control target
= control target key end

     0   :  { %s1013_s12 = smov 0   ;;  %s1477_s0 = inlined_call_operand.vmem [shape: f32[512,36], index: 0, kind: input, shape index: {}]   ;;  %s1478_s1 = inlined_call_operand.vmem [shape: f32[36,128], index: 1, kind: input, shape index: {}]   ;;  %s1479_s2 = inlined_call_operand.vmem [shape: f32[1,128], index: 2, kind: input, shape index: {}]   ;;  %s1480_s3 = inlined_call_operand.vmem [shape: f32[512,64], index: 3, kind: output, shape index: {}]  }
   0x1 LB: > { %s825_s13 = sadd.s32 4294967295, %s990_s12   ;;  %p829_p0 = scmp.ge.s32.totalorder %s990_s12, 1  ;;  %s990_s12 = sphi %s1013_s12, %s13_s12  }
   0x2   : > { %p138_p1 = scmp.lt.s32.totalorder %s990_s12, 3 }
   0x4   : > { %p139_p2 = pnand %p829_p0, %p138_p1 }
   0x5   : > { %s830_s18 = sshll.u32 (!%p139_p2), %s825_s13, 5  ;;  %s992_s4 = smov (!%p139_p2), 64  }
   0x6   : > { %142 = sbr.rel (%p139_p2) target bundleno = 398 (0x18e), region = 32  ;;  %p163_p3 = scmp.lt.s32.totalorder (!%p139_p2), %s830_s18, 63 }
   0xb   : > { %v210_v0 = vld [vmem:[%s1478_s1 + $0x20] sm:$0xf]  ;;  %vm315_vm0 = vcmask 1043456   ;;  %v209_v1 = vld [vmem:[%s1478_s1 + $0x18] sm:$0xff]  ;;  %v208_v2 = vld [vmem:[%s1478_s1 + $0x10] sm:$0xff]  ;;  %s1498_s18 = smov (!%p163_p3, %s830_s18), 63 }
   0xc   : > { %907 = vmatprep.subr.msk.mxu0 %vm315_vm0, %v210_v0  ;;  %965 = vmatprep.subr.msk.mxu1 %vm315_vm0, %v210_v0  ;;  %v207_v3 = vld [vmem:[%s1478_s1 + $0x8] sm:$0xff]  ;;  %s831_s23 = sshll.u32 %s1498_s18, 3  ;;  %v206_v4 = vld [vmem:[%s1478_s1] sm:$0xff]  ;;  %vm218_vm1 = vcmask 293888   ;;  %vm736_vm2 = vcmask 523264  }
   0xd   : > { %908 = vmatpush3.msk.msra.mxu0 %vm315_vm0, %v210_v0  ;;  %970 = vmatpush3.msk.msra.mxu1 %vm315_vm0, %v210_v0  ;;  %s1044_s28 = scalar_lea.vmem %s1477_s0, %s831_s23  ;;  %v1113_v37 = vld [vmem:[%s1479_s2] ss:$0 sm:$0xff]  ;;  %s1344_s7 = scalar_lea.vmem %s1480_s3, %s831_s23 }
   0xe   : > { %909 = vmatprep.subr.mxu0 %v209_v1  ;;  %966 = vmatprep.subr.mxu1 %v209_v1  ;;  %v174_v5 = vld [vmem:[%s1044_s28] sm:$0xff]  ;;  %v175_v7 = vld [vmem:[%s1044_s28 + $0x8] sm:$0xff]  ;;  %v176_v9 = vld [vmem:[%s1044_s28 + $0x10] sm:$0xff] }
   0xf   : > { %910 = vmatpush3.msra.mxu0 %v209_v1  ;;  %971 = vmatpush3.msra.mxu1 %v209_v1  ;;  %v190_v6 = vld [vmem:[%s1044_s28 + $0x80] sm:$0xff]  ;;  %v191_v8 = vld [vmem:[%s1044_s28 + $0x88] sm:$0xff]  ;;  %v192_v10 = vld [vmem:[%s1044_s28 + $0x90] sm:$0xff] }
  0x10   : > { %911 = vmatprep.subr.mxu0 %v208_v2  ;;  %967 = vmatprep.subr.mxu1 %v208_v2  ;;  %v177_v11 = vld [vmem:[%s1044_s28 + $0x18] sm:$0xff]  ;;  %v178_v13 = vld [vmem:[%s1044_s28 + $0x20] sm:$0xff]  ;;  %v179_v15 = vld [vmem:[%s1044_s28 + $0x28] sm:$0xff] }
  0x11   : > { %912 = vmatpush3.msra.mxu0 %v208_v2  ;;  %972 = vmatpush3.msra.mxu1 %v208_v2  ;;  %v193_v12 = vld [vmem:[%s1044_s28 + $0x98] sm:$0xff]  ;;  %v194_v14 = vld [vmem:[%s1044_s28 + $0xa0] sm:$0xff]  ;;  %v195_v16 = vld [vmem:[%s1044_s28 + $0xa8] sm:$0xff] }
  0x12   : > { %913 = vmatprep.subr.mxu0 %v207_v3  ;;  %968 = vmatprep.subr.mxu1 %v207_v3  ;;  %v180_v17 = vld [vmem:[%s1044_s28 + $0x30] sm:$0xff]  ;;  %v181_v19 = vld [vmem:[%s1044_s28 + $0x38] sm:$0xff]  ;;  %v182_v21 = vld [vmem:[%s1044_s28 + $0x40] sm:$0xff] }
  0x13   : > { %914 = vmatpush3.msra.mxu0 %v207_v3  ;;  %973 = vmatpush3.msra.mxu1 %v207_v3  ;;  %v196_v18 = vld [vmem:[%s1044_s28 + $0xb0] sm:$0xff]  ;;  %v197_v20 = vld [vmem:[%s1044_s28 + $0xb8] sm:$0xff]  ;;  %v198_v22 = vld [vmem:[%s1044_s28 + $0xc0] sm:$0xff] }
  0x14   : > { %915 = vmatprep.subr.mxu0 %v206_v4  ;;  %969 = vmatprep.subr.mxu1 %v206_v4  ;;  %v183_v23 = vld [vmem:[%s1044_s28 + $0x48] sm:$0xff]  ;;  %v184_v25 = vld [vmem:[%s1044_s28 + $0x50] sm:$0xff]  ;;  %v185_v27 = vld [vmem:[%s1044_s28 + $0x58] sm:$0xff] }
  0x15   : > { %916 = vmatpush3.msra.mxu0 %v206_v4  ;;  %974 = vmatpush3.msra.mxu1 %v206_v4  ;;  %v199_v24 = vld [vmem:[%s1044_s28 + $0xc8] sm:$0xff]  ;;  %v200_v26 = vld [vmem:[%s1044_s28 + $0xd0] sm:$0xff]  ;;  %v201_v28 = vld [vmem:[%s1044_s28 + $0xd8] sm:$0xff] }
  0x16   : > { %917 = vmatprep.mubr.msk.f32.mxu0 %vm218_vm1, %v174_v5  ;;  %941 = vmatprep.mubr.msk.f32.mxu1 %vm218_vm1, %v190_v6  ;;  %v186_v29 = vld [vmem:[%s1044_s28 + $0x60] sm:$0xff]  ;;  %v187_v31 = vld [vmem:[%s1044_s28 + $0x68] sm:$0xff]  ;;  %v188_v33 = vld [vmem:[%s1044_s28 + $0x70] sm:$0xff] }
  0x17   : > { %918 = vmatmul.mubr.msk.f32.vlgmr.msra.gmra.mxu0 %vm218_vm1, %v175_v7  ;;  %942 = vmatmul.mubr.msk.f32.vlgmr.msra.gmra.mxu1 %vm218_vm1, %v191_v8  ;;  %v202_v30 = vld [vmem:[%s1044_s28 + $0xe0] sm:$0xff]  ;;  %v203_v32 = vld [vmem:[%s1044_s28 + $0xe8] sm:$0xff]  ;;  %v204_v34 = vld [vmem:[%s1044_s28 + $0xf0] sm:$0xff] }
  0x18   : > { %920 = vmatprep.mubr.msk.f32.mxu0 %vm218_vm1, %v176_v9  ;;  %944 = vmatprep.mubr.msk.f32.mxu1 %vm218_vm1, %v192_v10  ;;  %v189_v35 = vld [vmem:[%s1044_s28 + $0x78] sm:$0xff] }
  0x19   : > { %v205_v36 = vld [vmem:[%s1044_s28 + $0xf8] sm:$0xff] }
  0x1b   : > { %921 = vmatmul.mubr.msk.f32.gmra.mxu0 %vm218_vm1, %v177_v11  ;;  %945 = vmatmul.mubr.msk.f32.gmra.mxu1 %vm218_vm1, %v193_v12 }
  0x1c   : > { %923 = vmatprep.mubr.msk.f32.mxu0 %vm218_vm1, %v178_v13  ;;  %947 = vmatprep.mubr.msk.f32.mxu1 %vm218_vm1, %v194_v14 }
  0x1f   : > { %924 = vmatmul.mubr.msk.f32.gmra.mxu0 %vm218_vm1, %v179_v15  ;;  %948 = vmatmul.mubr.msk.f32.gmra.mxu1 %vm218_vm1, %v195_v16 }
  0x20   : > { %926 = vmatprep.mubr.msk.f32.mxu0 %vm218_vm1, %v180_v17  ;;  %950 = vmatprep.mubr.msk.f32.mxu1 %vm218_vm1, %v196_v18 }
  0x23   : > { %927 = vmatmul.mubr.msk.f32.gmra.mxu0 %vm218_vm1, %v181_v19  ;;  %951 = vmatmul.mubr.msk.f32.gmra.mxu1 %vm218_vm1, %v197_v20 }
  0x24   : > { %929 = vmatprep.mubr.msk.f32.mxu0 %vm218_vm1, %v182_v21  ;;  %953 = vmatprep.mubr.msk.f32.mxu1 %vm218_vm1, %v198_v22 }
  0x27   : > { %930 = vmatmul.mubr.msk.f32.gmra.mxu0 %vm218_vm1, %v183_v23  ;;  %954 = vmatmul.mubr.msk.f32.gmra.mxu1 %vm218_vm1, %v199_v24 }
  0x28   : > { %932 = vmatprep.mubr.msk.f32.mxu0 %vm218_vm1, %v184_v25  ;;  %956 = vmatprep.mubr.msk.f32.mxu1 %vm218_vm1, %v200_v26 }
  0x2b   : > { %933 = vmatmul.mubr.msk.f32.gmra.mxu0 %vm218_vm1, %v185_v27  ;;  %957 = vmatmul.mubr.msk.f32.gmra.mxu1 %vm218_vm1, %v201_v28 }
  0x2c   : > { %935 = vmatprep.mubr.msk.f32.mxu0 %vm218_vm1, %v186_v29  ;;  %959 = vmatprep.mubr.msk.f32.mxu1 %vm218_vm1, %v202_v30 }
  0x2f   : > { %936 = vmatmul.mubr.msk.f32.gmra.mxu0 %vm218_vm1, %v187_v31  ;;  %960 = vmatmul.mubr.msk.f32.gmra.mxu1 %vm218_vm1, %v203_v32 }
  0x30   : > { %938 = vmatprep.mubr.msk.f32.mxu0 %vm218_vm1, %v188_v33  ;;  %962 = vmatprep.mubr.msk.f32.mxu1 %vm218_vm1, %v204_v34 }
  0x33   : > { %939 = vmatmul.mubr.msk.f32.gmra.mxu0 %vm218_vm1, %v189_v35  ;;  %963 = vmatmul.mubr.msk.f32.gmra.mxu1 %vm218_vm1, %v205_v36 }
  0xd7   : > { %v919_v38 = vpop.f32.mrf.mxu0  ;;  %v943_v39 = vpop.f32.mrf.mxu1 }
  0xd8   : > { %v1116_v40 = vadd.f32 %v919_v38, %v1113_v37  ;;  %v1119_v41 = vadd.f32 %v943_v39, %v1113_v37 }
  0xd9   : > { %v385_v42 = vpop.f32.mrf.mxu0  ;;  %v465_v43 = vpop.f32.mrf.mxu1 }
  0xda   : > { %v545_v44 = vmax.f32 %v1116_v40, 0.0  ;;  %v561_v45 = vmax.f32 %v1119_v41, 0.0  ;;  %v1124_v46 = vadd.f32 %v1113_v37, %v385_v42  ;;  %v1140_v53 = vadd.f32 %v1113_v37, %v465_v43 }
  0xdb   : > { %v922_v47 = vpop.f32.mrf.mxu0  ;;  %v946_v48 = vpop.f32.mrf.mxu1 }
  0xdc   : > { %v1127_v49 = vadd.f32 %v922_v47, %v1113_v37  ;;  %642 = vrot.lane.b32.xlu1 %v561_v45, %s992_s4  ;;  %610 = vrot.lane.b32.xlu0 %v545_v44, %s992_s4  ;;  %v1136_v50 = vadd.f32 %v946_v48, %v1113_v37  ;;  %v544_v52 = vmax.f32 %v1124_v46, 0.0  ;;  %v560_v58 = vmax.f32 %v1140_v53, 0.0 }
  0xdd   : > { %v395_v51 = vpop.f32.mrf.mxu0  ;;  %v475_v55 = vpop.f32.mrf.mxu1 }
  0xde   : > { %v547_v54 = vmax.f32 %v1127_v49, 0.0  ;;  %v563_v57 = vmax.f32 %v1136_v50, 0.0  ;;  %v1152_v59 = vadd.f32 %v1113_v37, %v395_v51  ;;  %v1155_v60 = vadd.f32 %v1113_v37, %v475_v55 }
  0xdf   : > { %v925_v56 = vpop.f32.mrf.mxu0  ;;  %v949_v62 = vpop.f32.mrf.mxu1 }
  0xe0   : > { %614 = vrot.lane.b32.xlu1 %v547_v54, %s992_s4  ;;  %608 = vrot.lane.b32.xlu0 %v544_v52, %s992_s4  ;;  %v546_v63 = vmax.f32 %v1152_v59, 0.0  ;;  %v562_v0 = vmax.f32 %v1155_v60, 0.0  ;;  %v1166_v1 = vadd.f32 %v925_v56, %v1113_v37  ;;  %v1180_v7 = vadd.f32 %v949_v62, %v1113_v37 }
  0xe1   : > { %v405_v61 = vpop.f32.mrf.mxu0  ;;  %v485_v3 = vpop.f32.mrf.mxu1 }
  0xe2   : > { %v1169_v2 = vadd.f32 %v1113_v37, %v405_v61  ;;  %v549_v5 = vmax.f32 %v1166_v1, 0.0  ;;  %v1183_v8 = vadd.f32 %v1113_v37, %v485_v3  ;;  %v565_v11 = vmax.f32 %v1180_v7, 0.0 }
  0xe3   : > { %v928_v4 = vpop.f32.mrf.mxu0  ;;  %v952_v10 = vpop.f32.mrf.mxu1 }
  0xe4   : > { %646 = vrot.lane.b32.xlu1 %v563_v57, %s992_s4  ;;  %640 = vrot.lane.b32.xlu0 %v560_v58, %s992_s4  ;;  %v548_v6 = vmax.f32 %v1169_v2, 0.0  ;;  %v564_v12 = vmax.f32 %v1183_v8, 0.0  ;;  %v1194_v13 = vadd.f32 %v928_v4, %v1113_v37  ;;  %v1208_v19 = vadd.f32 %v952_v10, %v1113_v37 }
  0xe5   : > { %v415_v9 = vpop.f32.mrf.mxu0  ;;  %v495_v15 = vpop.f32.mrf.mxu1 }
  0xe6   : > { %v1197_v14 = vadd.f32 %v1113_v37, %v415_v9  ;;  %v551_v17 = vmax.f32 %v1194_v13, 0.0  ;;  %v1211_v20 = vadd.f32 %v1113_v37, %v495_v15  ;;  %v567_v23 = vmax.f32 %v1208_v19, 0.0 }
  0xe7   : > { %v931_v16 = vpop.f32.mrf.mxu0  ;;  %v955_v22 = vpop.f32.mrf.mxu1 }
  0xe8   : > { %612 = vrot.lane.b32.xlu1 %v546_v63, %s992_s4  ;;  %644 = vrot.lane.b32.xlu0 %v562_v0, %s992_s4  ;;  %v550_v18 = vmax.f32 %v1197_v14, 0.0  ;;  %v566_v24 = vmax.f32 %v1211_v20, 0.0  ;;  %v1222_v25 = vadd.f32 %v931_v16, %v1113_v37  ;;  %v1236_v31 = vadd.f32 %v955_v22, %v1113_v37 }
  0xe9   : > { %v425_v21 = vpop.f32.mrf.mxu0  ;;  %v505_v27 = vpop.f32.mrf.mxu1 }
  0xea   : > { %v1225_v26 = vadd.f32 %v1113_v37, %v425_v21  ;;  %v553_v29 = vmax.f32 %v1222_v25, 0.0  ;;  %v1239_v32 = vadd.f32 %v1113_v37, %v505_v27  ;;  %v569_v35 = vmax.f32 %v1236_v31, 0.0 }
  0xeb   : > { %v934_v28 = vpop.f32.mrf.mxu0  ;;  %v958_v34 = vpop.f32.mrf.mxu1 }
  0xec   : > { %618 = vrot.lane.b32.xlu1 %v549_v5, %s992_s4  ;;  %616 = vrot.lane.b32.xlu0 %v548_v6, %s992_s4  ;;  %v552_v30 = vmax.f32 %v1225_v26, 0.0  ;;  %v568_v36 = vmax.f32 %v1239_v32, 0.0  ;;  %v1250_v38 = vadd.f32 %v934_v28, %v1113_v37  ;;  %v1264_v51 = vadd.f32 %v958_v34, %v1113_v37 }
  0xed   : > { %v435_v33 = vpop.f32.mrf.mxu0  ;;  %v515_v42 = vpop.f32.mrf.mxu1 }
  0xee   : > { %v1253_v39 = vadd.f32 %v1113_v37, %v435_v33  ;;  %v555_v47 = vmax.f32 %v1250_v38, 0.0  ;;  %v1267_v55 = vadd.f32 %v1113_v37, %v515_v42  ;;  %v571_v62 = vmax.f32 %v1264_v51, 0.0 }
  0xef   : > { %v937_v43 = vpop.f32.mrf.mxu0  ;;  %v961_v61 = vpop.f32.mrf.mxu1 }
  0xf0   : > { %650 = vrot.lane.b32.xlu1 %v565_v11, %s992_s4  ;;  %648 = vrot.lane.b32.xlu0 %v564_v12, %s992_s4  ;;  %v554_v48 = vmax.f32 %v1253_v39, 0.0  ;;  %v570_v3 = vmax.f32 %v1267_v55, 0.0  ;;  %v1278_v4 = vadd.f32 %v937_v43, %v1113_v37  ;;  %v1292_v22 = vadd.f32 %v961_v61, %v1113_v37 }
  0xf1   : > { %v445_v56 = vpop.f32.mrf.mxu0  ;;  %v525_v10 = vpop.f32.mrf.mxu1 }
  0xf2   : > { %v1281_v9 = vadd.f32 %v1113_v37, %v445_v56  ;;  %v1482_v16 = vmax.f32 %v1278_v4, 0.0  ;;  %v1295_v27 = vadd.f32 %v1113_v37, %v525_v10  ;;  %v1488_v34 = vmax.f32 %v1292_v22, 0.0 }
  0xf3   : > { %v940_v15 = vpop.f32.mrf.mxu0  ;;  %v964_v33 = vpop.f32.mrf.mxu1 }
  0xf4   : > { %622 = vrot.lane.b32.xlu1 %v551_v17, %s992_s4  ;;  %620 = vrot.lane.b32.xlu0 %v550_v18, %s992_s4  ;;  %v1481_v21 = vmax.f32 %v1281_v9, 0.0  ;;  %v1483_v42 = vmax.f32 %v1295_v27, 0.0  ;;  %v1306_v43 = vadd.f32 %v940_v15, %v1113_v37 }
  0xf5   : > { %v455_v28 = vpop.f32.mrf.mxu0  ;;  %v535_v61 = vpop.f32.mrf.mxu1 }
  0xf6   : > { %v1309_v56 = vadd.f32 %v1113_v37, %v455_v28  ;;  %v1487_v10 = vmax.f32 %v1306_v43, 0.0  ;;  %v1323_v15 = vadd.f32 %v1113_v37, %v535_v61 }
  0xf8   : > { %654 = vrot.lane.b32.xlu1 %v567_v23, %s992_s4  ;;  %652 = vrot.lane.b32.xlu0 %v566_v24, %s992_s4 }
  0xfc   : > { %626 = vrot.lane.b32.xlu1 %v553_v29, %s992_s4  ;;  %624 = vrot.lane.b32.xlu0 %v552_v30, %s992_s4 }
 0x100   : > { %658 = vrot.lane.b32.xlu1 %v569_v35, %s992_s4  ;;  %656 = vrot.lane.b32.xlu0 %v568_v36, %s992_s4 }
 0x104   : > { %630 = vrot.lane.b32.xlu1 %v555_v47, %s992_s4  ;;  %628 = vrot.lane.b32.xlu0 %v554_v48, %s992_s4 }
 0x108   : > { %662 = vrot.lane.b32.xlu1 %v571_v62, %s992_s4  ;;  %660 = vrot.lane.b32.xlu0 %v570_v3, %s992_s4 }
 0x10c   : > { %634 = vrot.lane.b32.xlu1 %v1482_v16, %s992_s4  ;;  %632 = vrot.lane.b32.xlu0 %v1481_v21, %s992_s4  ;;  %v1486_v21 = vmax.f32 %v1309_v56, 0.0  ;;  %v1320_v16 = vadd.f32 %v964_v33, %v1113_v37 }
 0x10e   : > { %v1485_v28 = vmax.f32 %v1320_v16, 0.0 }
 0x110   : > { %666 = vrot.lane.b32.xlu1 %v1488_v34, %s992_s4  ;;  %664 = vrot.lane.b32.xlu0 %v1483_v42, %s992_s4  ;;  %v1484_v42 = vmax.f32 %v1323_v15, 0.0 }
 0x114   : > { %638 = vrot.lane.b32.xlu1 %v1487_v10, %s992_s4  ;;  %636 = vrot.lane.b32.xlu0 %v1486_v21, %s992_s4 }
 0x118   : > { %670 = vrot.lane.b32.xlu1 %v1485_v28, %s992_s4  ;;  %668 = vrot.lane.b32.xlu0 %v1484_v42, %s992_s4 }
 0x14e   : > { %v643_v37 = vpop.permute.xlu1 %642  ;;  %v611_v33 = vpop.permute.xlu0 %610 }
 0x14f   : > { %v721_v61 = vadd.f32 %v643_v37, %v561_v45  ;;  %v705_v42 = vadd.f32 %v611_v33, %v545_v44  ;;  %v1494_v33 = vmax.f32 %v1309_v56, 0.0 }
 0x151   : > { %754 = vst.msk [vmem:[%s1344_s7 + $0x88] sm:$0xff] %vm736_vm2, %v721_v61  ;;  %738 = vst.msk [vmem:[%s1344_s7 + $0x8] sm:$0xff] %vm736_vm2, %v705_v42  ;;  %v1492_v42 = vmax.f32 %v1295_v27, 0.0  ;;  %v1495_v27 = vmax.f32 %v1320_v16, 0.0 }
 0x152   : > { %v615_v28 = vpop.permute.xlu1 %614  ;;  %v609_v21 = vpop.permute.xlu0 %608 }
 0x153   : > { %v707_v10 = vadd.f32 %v615_v28, %v547_v54  ;;  %v704_v34 = vadd.f32 %v609_v21, %v544_v52  ;;  %v1490_v21 = vmax.f32 %v1281_v9, 0.0  ;;  %v1493_v28 = vmax.f32 %v1306_v43, 0.0 }
 0x155   : > { %740 = vst.msk [vmem:[%s1344_s7 + $0x18] sm:$0xff] %vm736_vm2, %v707_v10  ;;  %737 = vst.msk [vmem:[%s1344_s7] sm:$0xff] %vm736_vm2, %v704_v34 }
 0x156   : > { %v647_v40 = vpop.permute.xlu1 %646  ;;  %v641_v41 = vpop.permute.xlu0 %640 }
 0x157   : > { %v723_v44 = vadd.f32 %v647_v40, %v563_v57  ;;  %v720_v45 = vadd.f32 %v641_v41, %v560_v58 }
 0x159   : > { %756 = vst.msk [vmem:[%s1344_s7 + $0x98] sm:$0xff] %vm736_vm2, %v723_v44  ;;  %753 = vst.msk [vmem:[%s1344_s7 + $0x80] sm:$0xff] %vm736_vm2, %v720_v45  ;;  %v1496_v44 = vmax.f32 %v1323_v15, 0.0 }
 0x15a   : > { %v613_v46 = vpop.permute.xlu1 %612  ;;  %v645_v49 = vpop.permute.xlu0 %644 }
 0x15b   : > { %v706_v52 = vadd.f32 %v613_v46, %v546_v63  ;;  %v722_v54 = vadd.f32 %v645_v49, %v562_v0 }
 0x15d   : > { %739 = vst.msk [vmem:[%s1344_s7 + $0x10] sm:$0xff] %vm736_vm2, %v706_v52  ;;  %755 = vst.msk [vmem:[%s1344_s7 + $0x90] sm:$0xff] %vm736_vm2, %v722_v54 }
 0x15e   : > { %v619_v50 = vpop.permute.xlu1 %618  ;;  %v617_v53 = vpop.permute.xlu0 %616 }
 0x15f   : > { %v709_v57 = vadd.f32 %v619_v50, %v549_v5  ;;  %v708_v58 = vadd.f32 %v617_v53, %v548_v6 }
 0x161   : > { %742 = vst.msk [vmem:[%s1344_s7 + $0x28] sm:$0xff] %vm736_vm2, %v709_v57  ;;  %741 = vst.msk [vmem:[%s1344_s7 + $0x20] sm:$0xff] %vm736_vm2, %v708_v58 }
 0x162   : > { %v651_v59 = vpop.permute.xlu1 %650  ;;  %v649_v60 = vpop.permute.xlu0 %648 }
 0x163   : > { %v725_v63 = vadd.f32 %v651_v59, %v565_v11  ;;  %v724_v0 = vadd.f32 %v649_v60, %v564_v12 }
 0x165   : > { %758 = vst.msk [vmem:[%s1344_s7 + $0xa8] sm:$0xff] %vm736_vm2, %v725_v63  ;;  %757 = vst.msk [vmem:[%s1344_s7 + $0xa0] sm:$0xff] %vm736_vm2, %v724_v0 }
 0x166   : > { %v623_v1 = vpop.permute.xlu1 %622  ;;  %v621_v2 = vpop.permute.xlu0 %620 }
 0x167   : > { %v711_v5 = vadd.f32 %v623_v1, %v551_v17  ;;  %v710_v6 = vadd.f32 %v621_v2, %v550_v18 }
 0x169   : > { %744 = vst.msk [vmem:[%s1344_s7 + $0x38] sm:$0xff] %vm736_vm2, %v711_v5  ;;  %743 = vst.msk [vmem:[%s1344_s7 + $0x30] sm:$0xff] %vm736_vm2, %v710_v6 }
 0x16a   : > { %v655_v7 = vpop.permute.xlu1 %654  ;;  %v653_v8 = vpop.permute.xlu0 %652 }
 0x16b   : > { %v727_v11 = vadd.f32 %v655_v7, %v567_v23  ;;  %v726_v12 = vadd.f32 %v653_v8, %v566_v24 }
 0x16d   : > { %760 = vst.msk [vmem:[%s1344_s7 + $0xb8] sm:$0xff] %vm736_vm2, %v727_v11  ;;  %759 = vst.msk [vmem:[%s1344_s7 + $0xb0] sm:$0xff] %vm736_vm2, %v726_v12 }
 0x16e   : > { %v627_v13 = vpop.permute.xlu1 %626  ;;  %v625_v14 = vpop.permute.xlu0 %624 }
 0x16f   : > { %v713_v17 = vadd.f32 %v627_v13, %v553_v29  ;;  %v712_v18 = vadd.f32 %v625_v14, %v552_v30 }
 0x171   : > { %746 = vst.msk [vmem:[%s1344_s7 + $0x48] sm:$0xff] %vm736_vm2, %v713_v17  ;;  %745 = vst.msk [vmem:[%s1344_s7 + $0x40] sm:$0xff] %vm736_vm2, %v712_v18 }
 0x172   : > { %v659_v19 = vpop.permute.xlu1 %658  ;;  %v657_v20 = vpop.permute.xlu0 %656 }
 0x173   : > { %v729_v23 = vadd.f32 %v659_v19, %v569_v35  ;;  %v728_v24 = vadd.f32 %v657_v20, %v568_v36 }
 0x175   : > { %762 = vst.msk [vmem:[%s1344_s7 + $0xc8] sm:$0xff] %vm736_vm2, %v729_v23  ;;  %761 = vst.msk [vmem:[%s1344_s7 + $0xc0] sm:$0xff] %vm736_vm2, %v728_v24 }
 0x176   : > { %v631_v25 = vpop.permute.xlu1 %630  ;;  %v629_v26 = vpop.permute.xlu0 %628 }
 0x177   : > { %v715_v29 = vadd.f32 %v631_v25, %v555_v47  ;;  %v714_v30 = vadd.f32 %v629_v26, %v554_v48  ;;  %v1489_v47 = vmax.f32 %v1278_v4, 0.0 }
 0x179   : > { %748 = vst.msk [vmem:[%s1344_s7 + $0x58] sm:$0xff] %vm736_vm2, %v715_v29  ;;  %747 = vst.msk [vmem:[%s1344_s7 + $0x50] sm:$0xff] %vm736_vm2, %v714_v30 }
 0x17a   : > { %v663_v31 = vpop.permute.xlu1 %662  ;;  %v661_v32 = vpop.permute.xlu0 %660 }
 0x17b   : > { %v731_v35 = vadd.f32 %v663_v31, %v571_v62  ;;  %v730_v36 = vadd.f32 %v661_v32, %v570_v3  ;;  %v1491_v62 = vmax.f32 %v1292_v22, 0.0 }
 0x17d   : > { %764 = vst.msk [vmem:[%s1344_s7 + $0xd8] sm:$0xff] %vm736_vm2, %v731_v35  ;;  %763 = vst.msk [vmem:[%s1344_s7 + $0xd0] sm:$0xff] %vm736_vm2, %v730_v36 }
 0x17e   : > { %v635_v38 = vpop.permute.xlu1 %634  ;;  %v633_v39 = vpop.permute.xlu0 %632 }
 0x17f   : > { %v717_v48 = vadd.f32 %v635_v38, %v1489_v47  ;;  %v716_v34 = vadd.f32 %v633_v39, %v1490_v21 }
 0x181   : > { %750 = vst.msk [vmem:[%s1344_s7 + $0x68] sm:$0xff] %vm736_vm2, %v717_v48  ;;  %749 = vst.msk [vmem:[%s1344_s7 + $0x60] sm:$0xff] %vm736_vm2, %v716_v34 }
 0x182   : > { %v667_v51 = vpop.permute.xlu1 %666  ;;  %v665_v55 = vpop.permute.xlu0 %664 }
 0x183   : > { %v733_v3 = vadd.f32 %v667_v51, %v1491_v62  ;;  %v732_v10 = vadd.f32 %v665_v55, %v1492_v42 }
 0x185   : > { %766 = vst.msk [vmem:[%s1344_s7 + $0xe8] sm:$0xff] %vm736_vm2, %v733_v3  ;;  %765 = vst.msk [vmem:[%s1344_s7 + $0xe0] sm:$0xff] %vm736_vm2, %v732_v10 }
 0x186   : > { %v639_v4 = vpop.permute.xlu1 %638  ;;  %v637_v9 = vpop.permute.xlu0 %636 }
 0x187   : > { %v719_v37 = vadd.f32 %v639_v4, %v1493_v28  ;;  %v718_v61 = vadd.f32 %v637_v9, %v1494_v33 }
 0x189   : > { %752 = vst.msk [vmem:[%s1344_s7 + $0x78] sm:$0xff] %vm736_vm2, %v719_v37  ;;  %751 = vst.msk [vmem:[%s1344_s7 + $0x70] sm:$0xff] %vm736_vm2, %v718_v61 }
 0x18a   : > { %v671_v22 = vpop.permute.xlu1 %670  ;;  %v669_v40 = vpop.permute.xlu0 %668 }
 0x18b   : > { %v735_v41 = vadd.f32 %v671_v22, %v1495_v27  ;;  %v734_v45 = vadd.f32 %v669_v40, %v1496_v44 }
 0x18d   : > { %768 = vst.msk [vmem:[%s1344_s7 + $0xf8] sm:$0xff] %vm736_vm2, %v735_v41  ;;  %767 = vst.msk [vmem:[%s1344_s7 + $0xf0] sm:$0xff] %vm736_vm2, %v734_v45 }
 0x18e PF: > { %s13_s12 = sadd.s32 1, %s990_s12  }
 0x18f   : > { %p10_p4 = scmp.ge.s32.totalorder %s13_s12, 4  }
 0x191   :  { %12 = sbr.rel (!%p10_p4) target bundleno = 1 (0x1), region = 62 }

</bundles_post_ra>
